<compile_context>
chip_gen: v5e
topology: v5e:2x2
jax: 0.10.0
libtpu: 0.0.40
codegen_flags: <defaults>
</compile_context>

<pallas_src>
import jax
import jax.numpy as jnp
from jax.experimental import pallas as pl
from jax.experimental.pallas import tpu as pltpu


def _round_up(n, m):
    return (n + m - 1) // m * m


def _cdiv(a, b):
    return (a + b - 1) // b


# ---------------------------------------------------------------------------
# Kernel
# ---------------------------------------------------------------------------
def mlp_kernel(x_ref,
               w1_ref, b1_ref,
               w2_ref, b2_ref,
               w3_ref, b3_ref,
               w4_ref, b4_ref,
               o_ref):
    f32 = jnp.float32
    cdt = w1_ref.dtype  # compute dtype fed to the MXU (bf16)

    # In-kernel cast of the streamed x tile (VPU slot has slack; kernel is
    # MXU/DMA bound), instead of a separate padded bf16 copy in HBM.
    x = x_ref[...].astype(cdt)

    # Layer 1: (TB, D) @ (D, H1) on the MXU, f32 accumulation; f32 epilogue.
    h = jnp.dot(x, w1_ref[...], preferred_element_type=f32)
    h = jnp.maximum(h + b1_ref[...], 0.0)

    # Layer 2
    h = jnp.dot(h.astype(cdt), w2_ref[...], preferred_element_type=f32)
    h = jnp.maximum(h + b2_ref[...], 0.0)

    # Layer 3
    h = jnp.dot(h.astype(cdt), w3_ref[...], preferred_element_type=f32)
    h = jnp.maximum(h + b3_ref[...], 0.0)

    # Layer 4 (out_features == 1): VPU multiply + lane reduction instead of a
    # 1/128-utilized MXU pass; store lane-dense with batch on the lane axis.
    out = jnp.sum(h * w4_ref[...], axis=-1)                 # (TB,)
    o_ref[...] = (out[None, :] + b4_ref[0, 0]).astype(o_ref.dtype)


# ---------------------------------------------------------------------------
# Parameter prep (pad only hidden/output dims to 128, cast matmul weights bf16)
# ---------------------------------------------------------------------------
def init_params(key, input_size):
    """Deterministic init mirroring the PyTorch Linear shapes.
    PyTorch stores weight as (out, in); we store transposed (in, out)."""
    s1 = 2 * input_size
    s2 = input_size
    s3 = input_size
    dims = [(input_size, s1), (s1, s2), (s2, s3), (s3, 1)]
    params = {}
    keys = jax.random.split(key, 2 * len(dims))
    for i, (din, dout) in enumerate(dims):
        bound = 1.0 / float(din) ** 0.5   # same fan-in uniform bound as torch
        w = jax.random.uniform(keys[2 * i], (din, dout), jnp.float32, -bound, bound)
        b = jax.random.uniform(keys[2 * i + 1], (1, dout), jnp.float32, -bound, bound)
        params[f"w{i + 1}"] = w
        params[f"b{i + 1}"] = b
    return params


def pack_params(params, input_size, *, weight_dtype=jnp.bfloat16):
    """Zero-pad hidden/output feature dims to multiples of 128; keep the input
    feature dim (K of layer 1) unpadded so x needs no host-side padding.
    Zero padding is exact: padded lanes stay zero through matmul/bias/ReLU."""
    D = input_size
    H1 = _round_up(2 * D, 128)
    H2 = _round_up(D, 128)
    H3 = _round_up(D, 128)

    def pad2(a, r, c):
        return jnp.pad(a, ((0, r - a.shape[0]), (0, c - a.shape[1])))

    packed = {
        "w1": pad2(params["w1"], D, H1).astype(weight_dtype),
        "b1": pad2(params["b1"], 1, H1).astype(jnp.float32),
        "w2": pad2(params["w2"], H1, H2).astype(weight_dtype),
        "b2": pad2(params["b2"], 1, H2).astype(jnp.float32),
        "w3": pad2(params["w3"], H2, H3).astype(weight_dtype),
        "b3": pad2(params["b3"], 1, H3).astype(jnp.float32),
        # Final layer (N=1) stored as a lane-dense f32 row; computed on the VPU.
        "w4": pad2(params["w4"].T, 1, H3).astype(jnp.float32),
        # Scalar bias -> SMEM.
        "b4": params["b4"].reshape(1, 1).astype(jnp.float32),
    }
    dims = {"D": D, "H1": H1, "H2": H2, "H3": H3}
    return packed, dims


# ---------------------------------------------------------------------------
# Wrapper
# ---------------------------------------------------------------------------
def mlp_forward(x, packed, dims, *, block_b=None):
    """x: (B, input_size) f32. Returns (B, 1) f32 (same semantics as the module)."""
    B, D = x.shape
    H1, H2, H3 = dims["H1"], dims["H2"], dims["H3"]
    wdt = packed["w1"].dtype
    w_item = jnp.dtype(wdt).itemsize

    # Real device VMEM (v5e/v6e: 128 MiB, v7x: 64 MiB per TC), with headroom.
    try:
        vmem_cap = int(pltpu.get_tpu_info().vmem_capacity_bytes)
    except Exception:
        vmem_cap = 64 * 1024 * 1024  # conservative (v7x per-TC)

    if block_b is None:
        # Bigger tiles on 128-MiB parts (v5e/v6e); stay at 256 on v7x (64 MiB).
        block_b = 256 if vmem_cap <= 64 * 1024 * 1024 else 512

    # Batch tile: multiple of 128 when B > 128 (lane-dense output stores,
    # aligned MXU M); aim for >= 2 grid steps so v7x's two TCs both get work.
    if B <= min(block_b, 128):
        TB = B                                    # single partial tile, no padding
    else:
        n_tiles = max(2, _cdiv(B, block_b))
        TB = min(block_b, _round_up(_cdiv(B, n_tiles), 128))
    grid = (_cdiv(B, TB),)                        # Pallas masks the remainder tile

    # --- VMEM budget (explicit; no blanket 2x over-request) -------------------
    weight_bytes = ((D * H1 + H1 * H2 + H2 * H3) * w_item
                    + (H1 + H2 + H3 + H3) * 4)               # + f32 biases + w4 row
    io_bytes = 2 * (TB * D * 4 + TB * 4)                     # double-buffered x/out
    work_bytes = 3 * TB * max(H1, H2, H3) * 4                # f32 activation set

    def vmem_limit(weight_buffers):
        need = weight_buffers * weight_bytes + io_bytes + work_bytes
        return int(min(max(need + (8 << 20), 32 << 20), vmem_cap - (8 << 20)))

    flops = 2 * B * (D * H1 + H1 * H2 + H2 * H3 + H3)
    bytes_accessed = weight_bytes + B * D * 4 + B * 4

    def build(single_buffer_residents):
        # Constant index_map -> weights/biases are VMEM-resident; Buffered(1)
        # drops the default double-buffering (halves resident footprint).
        kw = ({"pipeline_mode": pl.Buffered(buffer_count=1)}
              if single_buffer_residents else {})

        def resident(shape):
            return pl.BlockSpec(shape, lambda i: (0, 0), **kw)

        in_specs = [
            pl.BlockSpec((TB, D), lambda i: (i, 0)),              # x tile (streams)
            resident((D, H1)),  resident((1, H1)),                # w1, b1
            resident((H1, H2)), resident((1, H2)),                # w2, b2
            resident((H2, H3)), resident((1, H3)),                # w3, b3
            resident((1, H3)),                                    # w4 row
            pl.BlockSpec(memory_space=pltpu.MemorySpace.SMEM),    # b4 scalar
        ]
        return pl.pallas_call(
            mlp_kernel,
            out_shape=jax.ShapeDtypeStruct((1, B), jnp.float32),
            grid=grid,
            in_specs=in_specs,
            # Lane-dense output: batch on the lane axis -> unmasked vector stores.
            out_specs=pl.BlockSpec((1, TB), lambda i: (0, i)),
            compiler_params=pltpu.CompilerParams(
                dimension_semantics=("parallel",),
                vmem_limit_bytes=vmem_limit(1 if single_buffer_residents else 2)),
            cost_estimate=pl.CostEstimate(
                flops=int(flops), transcendentals=0,
                bytes_accessed=int(bytes_accessed)),
        )

    args = (x, packed["w1"], packed["b1"], packed["w2"], packed["b2"],
            packed["w3"], packed["b3"], packed["w4"], packed["b4"])
    try:
        out = jax.block_until_ready(build(True)(*args))
    except Exception:
        # Fallback if this JAX build rejects single-buffered residents.
        out = build(False)(*args)

    return out[0, :, None]                                    # back to (B, 1)


# ---------------------------------------------------------------------------
# References
# ---------------------------------------------------------------------------
def mlp_reference_matched(x, packed):
    """Plain-JAX reference mirroring the kernel precision (bf16 MXU inputs,
    f32 accumulation, f32 epilogue)."""
    f32 = jnp.float32
    cdt = packed["w1"].dtype
    hp = jax.lax.Precision.HIGHEST

    def lin(h, w, b):
        return jnp.dot(h.astype(cdt).astype(f32), w.astype(f32), precision=hp) + b

    h = jnp.maximum(lin(x, packed["w1"], packed["b1"]), 0.0)
    h = jnp.maximum(lin(h, packed["w2"], packed["b2"]), 0.0)
    h = jnp.maximum(lin(h, packed["w3"], packed["b3"]), 0.0)
    return jnp.sum(h * packed["w4"].astype(f32), axis=-1, keepdims=True) + packed["b4"]


def mlp_reference_f32(x, p):
    """Pure-f32 reference matching the PyTorch module exactly."""
    hp = jax.lax.Precision.HIGHEST
    h = jnp.maximum(jnp.dot(x, p["w1"], precision=hp) + p["b1"], 0.0)
    h = jnp.maximum(jnp.dot(h, p["w2"], precision=hp) + p["b2"], 0.0)
    h = jnp.maximum(jnp.dot(h, p["w3"], precision=hp) + p["b3"], 0.0)
    return jnp.dot(h, p["w4"], precision=hp) + p["b4"]


if __name__ == "__main__":
    key = jax.random.PRNGKey(0)
    kx, kp = jax.random.split(key)

    input_size = 8
    batch = 16
    x = jax.random.normal(kx, (batch, input_size), jnp.float32)

    params = init_params(kp, input_size)
    packed, dims = pack_params(params, input_size)

    out = mlp_forward(x, packed, dims)
    out = jax.block_until_ready(out)
    assert out.shape == (batch, 1)

    # Exact-precision-matched check.
    ref_m = mlp_reference_matched(x, packed)
    assert jnp.allclose(out, ref_m, atol=1e-4, rtol=1e-4), "mismatch vs matched reference"

    # Looser check against the full-f32 PyTorch-equivalent forward (bf16 weights).
    ref_f = mlp_reference_f32(x, params)
    assert jnp.allclose(out, ref_f, atol=5e-2, rtol=5e-2), "mismatch vs f32 reference"

    print("KERNEL_OK")
</pallas_src>

<mosaic_0001>
module attributes {stable_mosaic.version = 11 : i64} {
  func.func @mlp_kernel(%arg0: i32, %arg1: memref<16x8xf32, #tpu.memory_space<vmem>>, %arg2: memref<8x128xbf16, #tpu.memory_space<vmem>>, %arg3: memref<1x128xf32, #tpu.memory_space<vmem>>, %arg4: memref<128x128xbf16, #tpu.memory_space<vmem>>, %arg5: memref<1x128xf32, #tpu.memory_space<vmem>>, %arg6: memref<128x128xbf16, #tpu.memory_space<vmem>>, %arg7: memref<1x128xf32, #tpu.memory_space<vmem>>, %arg8: memref<1x128xf32, #tpu.memory_space<vmem>>, %arg9: memref<1x1xf32, #tpu.memory_space<smem>>, %arg10: memref<1x16xf32, #tpu.memory_space<vmem>>) attributes {dimension_semantics = [#tpu.dimension_semantics<parallel>], iteration_bounds = array<i64: 1>, scalar_prefetch = 0 : i64, scratch_operands = 0 : i64, tpu.core_type = #tpu.core_type<tc>, window_params = [{transform_indices = @transform_0, window_bounds = array<i64: 16, 8>}, {pipeline_mode = #tpu.pipeline_mode<synchronous>, transform_indices = @transform_1, window_bounds = array<i64: 8, 128>}, {pipeline_mode = #tpu.pipeline_mode<synchronous>, transform_indices = @transform_2, window_bounds = array<i64: 1, 128>}, {pipeline_mode = #tpu.pipeline_mode<synchronous>, transform_indices = @transform_3, window_bounds = array<i64: 128, 128>}, {pipeline_mode = #tpu.pipeline_mode<synchronous>, transform_indices = @transform_4, window_bounds = array<i64: 1, 128>}, {pipeline_mode = #tpu.pipeline_mode<synchronous>, transform_indices = @transform_5, window_bounds = array<i64: 128, 128>}, {pipeline_mode = #tpu.pipeline_mode<synchronous>, transform_indices = @transform_6, window_bounds = array<i64: 1, 128>}, {pipeline_mode = #tpu.pipeline_mode<synchronous>, transform_indices = @transform_7, window_bounds = array<i64: 1, 128>}, {transform_indices = @transform_8, window_bounds = array<i64: 1, 1>}, {transform_indices = @transform_9, window_bounds = array<i64: 1, 16>}]} {
    %c0 = arith.constant 0 : index
    %c0_0 = arith.constant 0 : index
    %0 = vector.load %arg1[%c0, %c0_0] : memref<16x8xf32, #tpu.memory_space<vmem>>, vector<16x8xf32>
    %1 = arith.truncf %0 : vector<16x8xf32> to vector<16x8xbf16>
    %c0_1 = arith.constant 0 : index
    %c0_2 = arith.constant 0 : index
    %2 = vector.load %arg2[%c0_1, %c0_2] : memref<8x128xbf16, #tpu.memory_space<vmem>>, vector<8x128xbf16>
    %cst = arith.constant dense<0.000000e+00> : vector<16x128xf32>
    %3 = tpu.matmul %1, %2, %cst {dimension_numbers = #tpu.dot_dimension_numbers<[1], [0], [0], [1], [0, 0, 1, 1], [], []>} : vector<16x8xbf16>, vector<8x128xbf16>, vector<16x128xf32> -> vector<16x128xf32>
    %c0_3 = arith.constant 0 : index
    %c0_4 = arith.constant 0 : index
    %4 = vector.load %arg3[%c0_3, %c0_4] : memref<1x128xf32, #tpu.memory_space<vmem>>, vector<1x128xf32>
    %5 = vector.broadcast %4 : vector<1x128xf32> to vector<16x128xf32>
    %6 = arith.addf %3, %5 : vector<16x128xf32>
    %cst_5 = arith.constant 0.000000e+00 : f32
    %7 = vector.broadcast %cst_5 : f32 to vector<16x128xf32>
    %8 = arith.maximumf %6, %7 : vector<16x128xf32>
    %9 = arith.truncf %8 : vector<16x128xf32> to vector<16x128xbf16>
    %c0_6 = arith.constant 0 : index
    %c0_7 = arith.constant 0 : index
    %10 = vector.load %arg4[%c0_6, %c0_7] : memref<128x128xbf16, #tpu.memory_space<vmem>>, vector<128x128xbf16>
    %cst_8 = arith.constant dense<0.000000e+00> : vector<16x128xf32>
    %11 = tpu.matmul %9, %10, %cst_8 {dimension_numbers = #tpu.dot_dimension_numbers<[1], [0], [0], [1], [0, 0, 1, 1], [], []>} : vector<16x128xbf16>, vector<128x128xbf16>, vector<16x128xf32> -> vector<16x128xf32>
    %c0_9 = arith.constant 0 : index
    %c0_10 = arith.constant 0 : index
    %12 = vector.load %arg5[%c0_9, %c0_10] : memref<1x128xf32, #tpu.memory_space<vmem>>, vector<1x128xf32>
    %13 = vector.broadcast %12 : vector<1x128xf32> to vector<16x128xf32>
    %14 = arith.addf %11, %13 : vector<16x128xf32>
    %cst_11 = arith.constant 0.000000e+00 : f32
    %15 = vector.broadcast %cst_11 : f32 to vector<16x128xf32>
    %16 = arith.maximumf %14, %15 : vector<16x128xf32>
    %17 = arith.truncf %16 : vector<16x128xf32> to vector<16x128xbf16>
    %c0_12 = arith.constant 0 : index
    %c0_13 = arith.constant 0 : index
    %18 = vector.load %arg6[%c0_12, %c0_13] : memref<128x128xbf16, #tpu.memory_space<vmem>>, vector<128x128xbf16>
    %cst_14 = arith.constant dense<0.000000e+00> : vector<16x128xf32>
    %19 = tpu.matmul %17, %18, %cst_14 {dimension_numbers = #tpu.dot_dimension_numbers<[1], [0], [0], [1], [0, 0, 1, 1], [], []>} : vector<16x128xbf16>, vector<128x128xbf16>, vector<16x128xf32> -> vector<16x128xf32>
    %c0_15 = arith.constant 0 : index
    %c0_16 = arith.constant 0 : index
    %20 = vector.load %arg7[%c0_15, %c0_16] : memref<1x128xf32, #tpu.memory_space<vmem>>, vector<1x128xf32>
    %21 = vector.broadcast %20 : vector<1x128xf32> to vector<16x128xf32>
    %22 = arith.addf %19, %21 : vector<16x128xf32>
    %cst_17 = arith.constant 0.000000e+00 : f32
    %23 = vector.broadcast %cst_17 : f32 to vector<16x128xf32>
    %24 = arith.maximumf %22, %23 : vector<16x128xf32>
    %c0_18 = arith.constant 0 : index
    %c0_19 = arith.constant 0 : index
    %25 = vector.load %arg8[%c0_18, %c0_19] : memref<1x128xf32, #tpu.memory_space<vmem>>, vector<1x128xf32>
    %26 = vector.broadcast %25 : vector<1x128xf32> to vector<16x128xf32>
    %27 = arith.mulf %24, %26 : vector<16x128xf32>
    %cst_20 = arith.constant dense<0.000000e+00> : vector<16xf32>
    %28 = vector.multi_reduction <add>, %27, %cst_20 [1] : vector<16x128xf32> to vector<16xf32>
    %29 = vector.shape_cast %28 : vector<16xf32> to vector<1x16xf32>
    %c0_21 = arith.constant 0 : index
    %c0_22 = arith.constant 0 : index
    %30 = memref.load %arg9[%c0_21, %c0_22] : memref<1x1xf32, #tpu.memory_space<smem>>
    %31 = vector.broadcast %30 : f32 to vector<1x16xf32>
    %32 = arith.addf %29, %31 : vector<1x16xf32>
    %c0_23 = arith.constant 0 : index
    %c0_24 = arith.constant 0 : index
    %33 = vector.load %arg10[%c0_23, %c0_24] : memref<1x16xf32, #tpu.memory_space<vmem>>, vector<1x16xf32>
    tpu.vector_store %arg10[%c0_23, %c0_24], %32 {strides = array<i32>} : memref<1x16xf32, #tpu.memory_space<vmem>>, vector<1x16xf32>,
    return
  }
  func.func @transform_0(%arg0: i32) -> (i32, i32) {
    %c0_i32 = arith.constant 0 : i32
    %c0_i32_0 = arith.constant 0 : i32
    return %arg0, %c0_i32 : i32, i32
  }
  func.func @transform_1(%arg0: i32) -> (i32, i32) {
    %c0_i32 = arith.constant 0 : i32
    %c0_i32_0 = arith.constant 0 : i32
    %c0_i32_1 = arith.constant 0 : i32
    return %c0_i32, %c0_i32_0 : i32, i32
  }
  func.func @transform_2(%arg0: i32) -> (i32, i32) {
    %c0_i32 = arith.constant 0 : i32
    %c0_i32_0 = arith.constant 0 : i32
    %c0_i32_1 = arith.constant 0 : i32
    return %c0_i32, %c0_i32_0 : i32, i32
  }
  func.func @transform_3(%arg0: i32) -> (i32, i32) {
    %c0_i32 = arith.constant 0 : i32
    %c0_i32_0 = arith.constant 0 : i32
    %c0_i32_1 = arith.constant 0 : i32
    return %c0_i32, %c0_i32_0 : i32, i32
  }
  func.func @transform_4(%arg0: i32) -> (i32, i32) {
    %c0_i32 = arith.constant 0 : i32
    %c0_i32_0 = arith.constant 0 : i32
    %c0_i32_1 = arith.constant 0 : i32
    return %c0_i32, %c0_i32_0 : i32, i32
  }
  func.func @transform_5(%arg0: i32) -> (i32, i32) {
    %c0_i32 = arith.constant 0 : i32
    %c0_i32_0 = arith.constant 0 : i32
    %c0_i32_1 = arith.constant 0 : i32
    return %c0_i32, %c0_i32_0 : i32, i32
  }
  func.func @transform_6(%arg0: i32) -> (i32, i32) {
    %c0_i32 = arith.constant 0 : i32
    %c0_i32_0 = arith.constant 0 : i32
    %c0_i32_1 = arith.constant 0 : i32
    return %c0_i32, %c0_i32_0 : i32, i32
  }
  func.func @transform_7(%arg0: i32) -> (i32, i32) {
    %c0_i32 = arith.constant 0 : i32
    %c0_i32_0 = arith.constant 0 : i32
    %c0_i32_1 = arith.constant 0 : i32
    return %c0_i32, %c0_i32_0 : i32, i32
  }
  func.func @transform_8(%arg0: i32) -> (i32, i32) {
    %c0_i32 = arith.constant 0 : i32
    %c0_i32_0 = arith.constant 0 : i32
    %c0_i32_1 = arith.constant 0 : i32
    return %c0_i32, %c0_i32_0 : i32, i32
  }
  func.func @transform_9(%arg0: i32) -> (i32, i32) {
    %c0_i32 = arith.constant 0 : i32
    %c0_i32_0 = arith.constant 0 : i32
    return %c0_i32, %arg0 : i32, i32
  }
}

module attributes {stable_mosaic.version = 11 : i64} {
  func.func @mlp_kernel(%arg0: i32, %arg1: memref<16x8xf32, #tpu.memory_space<vmem>>, %arg2: memref<8x128xbf16, #tpu.memory_space<vmem>>, %arg3: memref<1x128xf32, #tpu.memory_space<vmem>>, %arg4: memref<128x128xbf16, #tpu.memory_space<vmem>>, %arg5: memref<1x128xf32, #tpu.memory_space<vmem>>, %arg6: memref<128x128xbf16, #tpu.memory_space<vmem>>, %arg7: memref<1x128xf32, #tpu.memory_space<vmem>>, %arg8: memref<1x128xf32, #tpu.memory_space<vmem>>, %arg9: memref<1x1xf32, #tpu.memory_space<smem>>, %arg10: memref<1x16xf32, #tpu.memory_space<vmem>>) attributes {dimension_semantics = [#tpu.dimension_semantics<parallel>], iteration_bounds = array<i64: 1>, scalar_prefetch = 0 : i64, scratch_operands = 0 : i64, tpu.core_type = #tpu.core_type<tc>, window_params = [{transform_indices = @transform_0, window_bounds = array<i64: 16, 8>}, {pipeline_mode = #tpu.pipeline_mode<synchronous>, transform_indices = @transform_1, window_bounds = array<i64: 8, 128>}, {pipeline_mode = #tpu.pipeline_mode<synchronous>, transform_indices = @transform_2, window_bounds = array<i64: 1, 128>}, {pipeline_mode = #tpu.pipeline_mode<synchronous>, transform_indices = @transform_3, window_bounds = array<i64: 128, 128>}, {pipeline_mode = #tpu.pipeline_mode<synchronous>, transform_indices = @transform_4, window_bounds = array<i64: 1, 128>}, {pipeline_mode = #tpu.pipeline_mode<synchronous>, transform_indices = @transform_5, window_bounds = array<i64: 128, 128>}, {pipeline_mode = #tpu.pipeline_mode<synchronous>, transform_indices = @transform_6, window_bounds = array<i64: 1, 128>}, {pipeline_mode = #tpu.pipeline_mode<synchronous>, transform_indices = @transform_7, window_bounds = array<i64: 1, 128>}, {transform_indices = @transform_8, window_bounds = array<i64: 1, 1>}, {transform_indices = @transform_9, window_bounds = array<i64: 1, 16>}]} {
    %c0 = arith.constant 0 : index
    %c0_0 = arith.constant 0 : index
    %0 = vector.load %arg1[%c0, %c0_0] : memref<16x8xf32, #tpu.memory_space<vmem>>, vector<16x8xf32>
    %1 = arith.truncf %0 : vector<16x8xf32> to vector<16x8xbf16>
    %c0_1 = arith.constant 0 : index
    %c0_2 = arith.constant 0 : index
    %2 = vector.load %arg2[%c0_1, %c0_2] : memref<8x128xbf16, #tpu.memory_space<vmem>>, vector<8x128xbf16>
    %cst = arith.constant dense<0.000000e+00> : vector<16x128xf32>
    %3 = tpu.matmul %1, %2, %cst {dimension_numbers = #tpu.dot_dimension_numbers<[1], [0], [0], [1], [0, 0, 1, 1], [], []>} : vector<16x8xbf16>, vector<8x128xbf16>, vector<16x128xf32> -> vector<16x128xf32>
    %c0_3 = arith.constant 0 : index
    %c0_4 = arith.constant 0 : index
    %4 = vector.load %arg3[%c0_3, %c0_4] : memref<1x128xf32, #tpu.memory_space<vmem>>, vector<1x128xf32>
    %5 = vector.broadcast %4 : vector<1x128xf32> to vector<16x128xf32>
    %6 = arith.addf %3, %5 : vector<16x128xf32>
    %cst_5 = arith.constant 0.000000e+00 : f32
    %7 = vector.broadcast %cst_5 : f32 to vector<16x128xf32>
    %8 = arith.maximumf %6, %7 : vector<16x128xf32>
    %9 = arith.truncf %8 : vector<16x128xf32> to vector<16x128xbf16>
    %c0_6 = arith.constant 0 : index
    %c0_7 = arith.constant 0 : index
    %10 = vector.load %arg4[%c0_6, %c0_7] : memref<128x128xbf16, #tpu.memory_space<vmem>>, vector<128x128xbf16>
    %cst_8 = arith.constant dense<0.000000e+00> : vector<16x128xf32>
    %11 = tpu.matmul %9, %10, %cst_8 {dimension_numbers = #tpu.dot_dimension_numbers<[1], [0], [0], [1], [0, 0, 1, 1], [], []>} : vector<16x128xbf16>, vector<128x128xbf16>, vector<16x128xf32> -> vector<16x128xf32>
    %c0_9 = arith.constant 0 : index
    %c0_10 = arith.constant 0 : index
    %12 = vector.load %arg5[%c0_9, %c0_10] : memref<1x128xf32, #tpu.memory_space<vmem>>, vector<1x128xf32>
    %13 = vector.broadcast %12 : vector<1x128xf32> to vector<16x128xf32>
    %14 = arith.addf %11, %13 : vector<16x128xf32>
    %cst_11 = arith.constant 0.000000e+00 : f32
    %15 = vector.broadcast %cst_11 : f32 to vector<16x128xf32>
    %16 = arith.maximumf %14, %15 : vector<16x128xf32>
    %17 = arith.truncf %16 : vector<16x128xf32> to vector<16x128xbf16>
    %c0_12 = arith.constant 0 : index
    %c0_13 = arith.constant 0 : index
    %18 = vector.load %arg6[%c0_12, %c0_13] : memref<128x128xbf16, #tpu.memory_space<vmem>>, vector<128x128xbf16>
    %cst_14 = arith.constant dense<0.000000e+00> : vector<16x128xf32>
    %19 = tpu.matmul %17, %18, %cst_14 {dimension_numbers = #tpu.dot_dimension_numbers<[1], [0], [0], [1], [0, 0, 1, 1], [], []>} : vector<16x128xbf16>, vector<128x128xbf16>, vector<16x128xf32> -> vector<16x128xf32>
    %c0_15 = arith.constant 0 : index
    %c0_16 = arith.constant 0 : index
    %20 = vector.load %arg7[%c0_15, %c0_16] : memref<1x128xf32, #tpu.memory_space<vmem>>, vector<1x128xf32>
    %21 = vector.broadcast %20 : vector<1x128xf32> to vector<16x128xf32>
    %22 = arith.addf %19, %21 : vector<16x128xf32>
    %cst_17 = arith.constant 0.000000e+00 : f32
    %23 = vector.broadcast %cst_17 : f32 to vector<16x128xf32>
    %24 = arith.maximumf %22, %23 : vector<16x128xf32>
    %c0_18 = arith.constant 0 : index
    %c0_19 = arith.constant 0 : index
    %25 = vector.load %arg8[%c0_18, %c0_19] : memref<1x128xf32, #tpu.memory_space<vmem>>, vector<1x128xf32>
    %26 = vector.broadcast %25 : vector<1x128xf32> to vector<16x128xf32>
    %27 = arith.mulf %24, %26 : vector<16x128xf32>
    %cst_20 = arith.constant dense<0.000000e+00> : vector<16xf32>
    %28 = vector.multi_reduction <add>, %27, %cst_20 [1] : vector<16x128xf32> to vector<16xf32>
    %29 = vector.shape_cast %28 : vector<16xf32> to vector<1x16xf32>
    %c0_21 = arith.constant 0 : index
    %c0_22 = arith.constant 0 : index
    %30 = memref.load %arg9[%c0_21, %c0_22] : memref<1x1xf32, #tpu.memory_space<smem>>
    %31 = vector.broadcast %30 : f32 to vector<1x16xf32>
    %32 = arith.addf %29, %31 : vector<1x16xf32>
    %c0_23 = arith.constant 0 : index
    %c0_24 = arith.constant 0 : index
    %33 = vector.load %arg10[%c0_23, %c0_24] : memref<1x16xf32, #tpu.memory_space<vmem>>, vector<1x16xf32>
    tpu.vector_store %arg10[%c0_23, %c0_24], %32 {strides = array<i32>} : memref<1x16xf32, #tpu.memory_space<vmem>>, vector<1x16xf32>,
    return
  }
  func.func @transform_0(%arg0: i32) -> (i32, i32) {
    %c0_i32 = arith.constant 0 : i32
    %c0_i32_0 = arith.constant 0 : i32
    return %arg0, %c0_i32 : i32, i32
  }
  func.func @transform_1(%arg0: i32) -> (i32, i32) {
    %c0_i32 = arith.constant 0 : i32
    %c0_i32_0 = arith.constant 0 : i32
    %c0_i32_1 = arith.constant 0 : i32
    return %c0_i32, %c0_i32_0 : i32, i32
  }
  func.func @transform_2(%arg0: i32) -> (i32, i32) {
    %c0_i32 = arith.constant 0 : i32
    %c0_i32_0 = arith.constant 0 : i32
    %c0_i32_1 = arith.constant 0 : i32
    return %c0_i32, %c0_i32_0 : i32, i32
  }
  func.func @transform_3(%arg0: i32) -> (i32, i32) {
    %c0_i32 = arith.constant 0 : i32
    %c0_i32_0 = arith.constant 0 : i32
    %c0_i32_1 = arith.constant 0 : i32
    return %c0_i32, %c0_i32_0 : i32, i32
  }
  func.func @transform_4(%arg0: i32) -> (i32, i32) {
    %c0_i32 = arith.constant 0 : i32
    %c0_i32_0 = arith.constant 0 : i32
    %c0_i32_1 = arith.constant 0 : i32
    return %c0_i32, %c0_i32_0 : i32, i32
  }
  func.func @transform_5(%arg0: i32) -> (i32, i32) {
    %c0_i32 = arith.constant 0 : i32
    %c0_i32_0 = arith.constant 0 : i32
    %c0_i32_1 = arith.constant 0 : i32
    return %c0_i32, %c0_i32_0 : i32, i32
  }
  func.func @transform_6(%arg0: i32) -> (i32, i32) {
    %c0_i32 = arith.constant 0 : i32
    %c0_i32_0 = arith.constant 0 : i32
    %c0_i32_1 = arith.constant 0 : i32
    return %c0_i32, %c0_i32_0 : i32, i32
  }
  func.func @transform_7(%arg0: i32) -> (i32, i32) {
    %c0_i32 = arith.constant 0 : i32
    %c0_i32_0 = arith.constant 0 : i32
    %c0_i32_1 = arith.constant 0 : i32
    return %c0_i32, %c0_i32_0 : i32, i32
  }
  func.func @transform_8(%arg0: i32) -> (i32, i32) {
    %c0_i32 = arith.constant 0 : i32
    %c0_i32_0 = arith.constant 0 : i32
    %c0_i32_1 = arith.constant 0 : i32
    return %c0_i32, %c0_i32_0 : i32, i32
  }
  func.func @transform_9(%arg0: i32) -> (i32, i32) {
    %c0_i32 = arith.constant 0 : i32
    %c0_i32_0 = arith.constant 0 : i32
    return %c0_i32, %arg0 : i32, i32
  }
}

</mosaic_0001>

<bundles_post_ra>
// kernel: tpu_custom_call.1
= control target key start
LH: loop header
LB: loop body
LE: loop exit
PB: predicated region body
PF: predicated region fallthrough
CT: control target
= control target key end

     0   :  { %15 = vsyncpa [#allocation4], 0  ;;  %s569_s0 = inlined_call_operand.vmem [shape: f32[16,8], index: 0, kind: input, shape index: {}]   ;;  %s570_s1 = inlined_call_operand.vmem [shape: bf16[8,128], index: 1, kind: input, shape index: {}]   ;;  %s571_s2 = inlined_call_operand.vmem [shape: f32[1,128], index: 2, kind: input, shape index: {}]   ;;  %s572_s3 = inlined_call_operand.hbm [shape: bf16[128,128], index: 3, kind: input, shape index: {}]   ;;  %s573_s4 = inlined_call_operand.vmem [shape: f32[1,128], index: 4, kind: input, shape index: {}]   ;;  %s574_s5 = inlined_call_operand.hbm [shape: bf16[128,128], index: 5, kind: input, shape index: {}]   ;;  %s575_s6 = inlined_call_operand.vmem [shape: f32[1,128], index: 6, kind: input, shape index: {}]   ;;  %s576_s7 = inlined_call_operand.vmem [shape: f32[1,128], index: 7, kind: input, shape index: {}]   ;;  %s577_s8 = inlined_call_operand.<no memory space> [shape: f32[1,1], index: 8, kind: input, shape index: {}]   ;;  %s578_s9 = inlined_call_operand.hbm [shape: f32[1,16], index: 9, kind: output, shape index: {}]  }
   0x1   :  { %16 = vsyncpa [#allocation7], 0 }
   0x2   :  { %17 = vsyncpa [#allocation5], 0  ;;  %s28_s11 = sshll.u32 %s572_s3, 4  ;;  %s481_s12 = smov [#allocation3]   ;;  %s29_s11 = int_to_ptr.hbm [resolvable:$true] %s28_s11 }
   0x3   :  { %s30_s13 = sshll.u32 %s481_s12, 4  ;;  %s43_s16 = sshll.u32 %s574_s5, 4  ;;  %s31_s13 = int_to_ptr.vmem [resolvable:$true] %s30_s13  ;;  %s44_s16 = int_to_ptr.hbm [resolvable:$true] %s43_s16 }
   0x4   :  { %s482_s17 = smov 64   ;;  %s483_s18 = smov 4  }
   0x5   :  { %36 = dma.hbm_to_vmem [thread:$0]  %s29_s11, 1024, %s31_s13, [#allocation4], %s482_s17, %s482_s17, %s483_s18  }
   0x6   :  { %s484_s19 = smov [#allocation6]  }
   0x7   :  { %s45_s20 = sshll.u32 %s484_s19, 4  ;;  %s46_s20 = int_to_ptr.vmem [resolvable:$true] %s45_s20 }
   0x8   :  { %51 = dma.hbm_to_vmem [thread:$0]  %s44_s16, 1024, %s46_s20, [#allocation7], %s482_s17, %s482_s17, %s483_s18  }
   0x9   :  { %475 = dma.done.wait [#allocation4], 1024  }
   0xa   :  { %476 = vsyncadd [#allocation4], 4294966272 }
   0xb   :  { %477 = dma.done.wait [#allocation7], 1024  }
   0xc   :  { %478 = vsyncadd [#allocation7], 4294966272  ;;  %vm79_vm0 = vcmask 1043456   ;;  %v70_v0 = vld [vmem:[%s570_s1] sm:$0xf]  ;;  %v68_v2 = vld [vmem:[%s569_s0 + $0x8] sm:$0xff]  ;;  %v285_v48 = vlaneseq  ;;  %v280_v49 = vstv %s577_s8 }
   0xd   :  { %v67_v1 = vld [vmem:[%s569_s0] sm:$0xff]  ;;  %v81_v3 = vsel %vm79_vm0, %v70_v0, 0  ;;  %v385_v5 = vld [vmem:[#allocation3 + $0x38] sm:$0xff]  ;;  %vm75_vm1 = vcmask 64512   ;;  %v384_v6 = vld [vmem:[#allocation3 + $0x30] sm:$0xff]  ;;  %s302_s12 = sshll.u32 %s578_s9, 4  ;;  %s303_s12 = int_to_ptr.hbm [resolvable:$true] %s302_s12 }
   0xe   :  { %v69_v4 = vpack.c.bf16 %v68_v2, %v67_v1  ;;  %90 = vmatpush.bf16.msra.mxu0 %v81_v3  ;;  %168 = vmatpush.bf16.msra.mxu1 %v385_v5  ;;  %v383_v7 = vld [vmem:[#allocation3 + $0x28] sm:$0xff]  ;;  %v382_v8 = vld [vmem:[#allocation3 + $0x20] sm:$0xff]  ;;  %v381_v9 = vld [vmem:[#allocation3 + $0x18] sm:$0xff]  ;;  %v286_v50 = vand.u32 127, %v285_v48  ;;  %vm290_vm2 = vcmask 130112   ;;  %vm293_vm3 = vcmask 122880  }
   0xf   :  { %v380_v10 = vld [vmem:[#allocation3 + $0x10] sm:$0xff]  ;;  %v379_v11 = vld [vmem:[#allocation3 + $0x8] sm:$0xff]  ;;  %v378_v12 = vld [vmem:[#allocation3] sm:$0xff] }
  0x10   :  { %v393_v13 = vld [vmem:[#allocation6 + $0x38] sm:$0xff]  ;;  %v392_v14 = vld [vmem:[#allocation6 + $0x30] sm:$0xff]  ;;  %v391_v15 = vld [vmem:[#allocation6 + $0x28] sm:$0xff]  ;;  %v288_v52 = vadd.s32 4294967288, %v286_v50 }
  0x11   :  { %313 = vmatmul.msk.bf16.vlgmr.msra.gmra.mxu0 %vm75_vm1, %v69_v4  ;;  %253 = vmatpush.bf16.msra.mxu2 %v393_v13  ;;  %v390_v16 = vld [vmem:[#allocation6 + $0x20] sm:$0xff]  ;;  %v389_v25 = vld [vmem:[#allocation6 + $0x18] sm:$0xff]  ;;  %v388_v26 = vld [vmem:[#allocation6 + $0x10] sm:$0xff] }
  0x12   :  { %169 = vmatpush.bf16.msra.mxu1 %v384_v6  ;;  %v399_v18 = vld [vmem:[%s571_s2] ss:$0 sm:$0xff]  ;;  %v387_v27 = vld [vmem:[#allocation6 + $0x8] sm:$0xff] }
  0x13   :  { %v386_v28 = vld [vmem:[#allocation6] sm:$0xff] }
  0x14   :  { %v400_v30 = vld [vmem:[%s573_s4] ss:$0 sm:$0xff] }
  0x15   :  { %254 = vmatpush.bf16.msra.mxu2 %v392_v14  ;;  %v401_v37 = vld [vmem:[%s575_s6] ss:$0 sm:$0xff]  ;;  %s485_s6 = smov [#allocation8]  }
  0x16   :  { %170 = vmatpush.bf16.msra.mxu1 %v383_v7  ;;  %v402_v40 = vld [vmem:[%s576_s7] ss:$0 sm:$0xff]  ;;  %s300_s7 = sshll.u32 %s485_s6, 4  ;;  %s301_s7 = int_to_ptr.vmem [resolvable:$true] %s300_s7 }
  0x19   :  { %255 = vmatpush.bf16.msra.mxu2 %v391_v15 }
  0x1a   :  { %171 = vmatpush.bf16.msra.mxu1 %v382_v8 }
  0x1d   :  { %256 = vmatpush.bf16.msra.mxu2 %v390_v16 }
  0x1e   :  { %172 = vmatpush.bf16.msra.mxu1 %v381_v9 }
  0x21   :  { %257 = vmatpush.bf16.msra.mxu2 %v389_v25 }
  0x22   :  { %173 = vmatpush.bf16.msra.mxu1 %v380_v10 }
  0x25   :  { %258 = vmatpush.bf16.msra.mxu2 %v388_v26 }
  0x26   :  { %174 = vmatpush.bf16.msra.mxu1 %v379_v11 }
  0x29   :  { %259 = vmatpush.bf16.msra.mxu2 %v387_v27 }
  0x2a   :  { %175 = vmatpush.bf16.msra.mxu1 %v378_v12 }
  0x2d   :  { %260 = vmatpush.bf16.msra.mxu2 %v386_v28 }
  0x8e   :  { %v92_v17 = vpop.f32.mrf.mxu0 }
  0x8f   :  { %v93_v19 = vadd.f32 %v399_v18, %v92_v17 }
  0x91   :  { %v97_v22 = vmax.f32 %v93_v19, 0.0 }
  0x96   :  { %v94_v20 = vpop.f32.mrf.mxu0 }
  0x97   :  { %v95_v21 = vadd.f32 %v399_v18, %v94_v20 }
  0x99   :  { %v98_v23 = vmax.f32 %v95_v21, 0.0 }
  0x9b   :  { %v99_v24 = vpack.c.bf16 %v98_v23, %v97_v22 }
  0x9d   :  { %176 = vmatmul.bf16.vlgmr.msra.gmra.mxu1 %v99_v24 }
 0x11a   :  { %v177_v29 = vpop.f32.mrf.mxu1 }
 0x11b   :  { %v178_v31 = vadd.f32 %v400_v30, %v177_v29 }
 0x11d   :  { %v182_v34 = vmax.f32 %v178_v31, 0.0 }
 0x122   :  { %v179_v32 = vpop.f32.mrf.mxu1 }
 0x123   :  { %v180_v33 = vadd.f32 %v400_v30, %v179_v32 }
 0x125   :  { %v183_v35 = vmax.f32 %v180_v33, 0.0 }
 0x127   :  { %v184_v36 = vpack.c.bf16 %v183_v35, %v182_v34 }
 0x129   :  { %261 = vmatmul.bf16.vlgmr.msra.gmra.mxu2 %v184_v36 }
 0x1ac   :  { %v262_v38 = vpop.f32.mrf.mxu2 }
 0x1ad   :  { %v263_v39 = vadd.f32 %v401_v37, %v262_v38 }
 0x1af   :  { %v267_v41 = vmax.f32 %v263_v39, 0.0 }
 0x1b1   :  { %v273_v42 = vmul.f32 %v402_v40, %v267_v41 }
 0x1b3   :  { %275 = vadd.xlane.f32.xlu0 %v273_v42 }
 0x1b4   :  { %v264_v43 = vpop.f32.mrf.mxu2 }
 0x1b5   :  { %v265_v44 = vadd.f32 %v401_v37, %v264_v43 }
 0x1b7   :  { %v268_v45 = vmax.f32 %v265_v44, 0.0 }
 0x1b9   :  { %v274_v46 = vmul.f32 %v402_v40, %v268_v45 }
 0x1bb   :  { %277 = vadd.xlane.f32.xlu0 %v274_v46 }
 0x226   :  { %v276_v47 = vpop.xlane.xlu0 %275 }
 0x227   :  { %v281_v51 = vadd.f32 %v280_v49, %v276_v47 }
 0x229   :  { %v287_v55 = vperm.slane %v281_v51, %v286_v50 }
 0x22e   :  { %v278_v53 = vpop.xlane.xlu0 %277 }
 0x22f   :  { %v282_v54 = vadd.f32 %v280_v49, %v278_v53 }
 0x231   :  { %v289_v56 = vperm.slane %v282_v54, %v288_v52 }
 0x233   :  { %v291_v57 = vsel %vm290_vm2, %v289_v56, %v287_v55 }
 0x234   :  { %294 = vst.msk [vmem:[#allocation8] sm:$0x1] %vm293_vm3, %v291_v57 }
 0x235   :  { %305 = dma.vmem_to_hbm [thread:$0]  %s301_s7, 16, %s303_s12, [#allocation5]  }
 0x236   :  { %479 = dma.done.wait [#allocation5], 16  }
 0x237   :  { %480 = vsyncadd [#allocation5], 4294967280 }
 0x238   :  { %310 = vsyncpa [#allocation4], 1 }
 0x239   :  { %311 = vsyncpa [#allocation7], 1 }
 0x23a   :  { %312 = vsyncpa [#allocation5], 1 }

// kernel: tpu_custom_call.1
= control target key start
LH: loop header
LB: loop body
LE: loop exit
PB: predicated region body
PF: predicated region fallthrough
CT: control target
= control target key end

     0   :  { %15 = vsyncpa [#allocation4], 0  ;;  %s569_s0 = inlined_call_operand.vmem [shape: f32[16,8], index: 0, kind: input, shape index: {}]   ;;  %s570_s1 = inlined_call_operand.vmem [shape: bf16[8,128], index: 1, kind: input, shape index: {}]   ;;  %s571_s2 = inlined_call_operand.vmem [shape: f32[1,128], index: 2, kind: input, shape index: {}]   ;;  %s572_s3 = inlined_call_operand.hbm [shape: bf16[128,128], index: 3, kind: input, shape index: {}]   ;;  %s573_s4 = inlined_call_operand.vmem [shape: f32[1,128], index: 4, kind: input, shape index: {}]   ;;  %s574_s5 = inlined_call_operand.hbm [shape: bf16[128,128], index: 5, kind: input, shape index: {}]   ;;  %s575_s6 = inlined_call_operand.vmem [shape: f32[1,128], index: 6, kind: input, shape index: {}]   ;;  %s576_s7 = inlined_call_operand.vmem [shape: f32[1,128], index: 7, kind: input, shape index: {}]   ;;  %s577_s8 = inlined_call_operand.<no memory space> [shape: f32[1,1], index: 8, kind: input, shape index: {}]   ;;  %s578_s9 = inlined_call_operand.hbm [shape: f32[1,16], index: 9, kind: output, shape index: {}]  }
   0x1   :  { %16 = vsyncpa [#allocation7], 0 }
   0x2   :  { %17 = vsyncpa [#allocation5], 0  ;;  %s28_s11 = sshll.u32 %s572_s3, 4  ;;  %s481_s12 = smov [#allocation3]   ;;  %s29_s11 = int_to_ptr.hbm [resolvable:$true] %s28_s11 }
   0x3   :  { %s30_s13 = sshll.u32 %s481_s12, 4  ;;  %s43_s16 = sshll.u32 %s574_s5, 4  ;;  %s31_s13 = int_to_ptr.vmem [resolvable:$true] %s30_s13  ;;  %s44_s16 = int_to_ptr.hbm [resolvable:$true] %s43_s16 }
   0x4   :  { %s482_s17 = smov 64   ;;  %s483_s18 = smov 4  }
   0x5   :  { %36 = dma.hbm_to_vmem [thread:$0]  %s29_s11, 1024, %s31_s13, [#allocation4], %s482_s17, %s482_s17, %s483_s18  }
   0x6   :  { %s484_s19 = smov [#allocation6]  }
   0x7   :  { %s45_s20 = sshll.u32 %s484_s19, 4  ;;  %s46_s20 = int_to_ptr.vmem [resolvable:$true] %s45_s20 }
   0x8   :  { %51 = dma.hbm_to_vmem [thread:$0]  %s44_s16, 1024, %s46_s20, [#allocation7], %s482_s17, %s482_s17, %s483_s18  }
   0x9   :  { %475 = dma.done.wait [#allocation4], 1024  }
   0xa   :  { %476 = vsyncadd [#allocation4], 4294966272 }
   0xb   :  { %477 = dma.done.wait [#allocation7], 1024  }
   0xc   :  { %478 = vsyncadd [#allocation7], 4294966272  ;;  %vm79_vm0 = vcmask 1043456   ;;  %v70_v0 = vld [vmem:[%s570_s1] sm:$0xf]  ;;  %v68_v2 = vld [vmem:[%s569_s0 + $0x8] sm:$0xff]  ;;  %v285_v48 = vlaneseq  ;;  %v280_v49 = vstv %s577_s8 }
   0xd   :  { %v67_v1 = vld [vmem:[%s569_s0] sm:$0xff]  ;;  %v81_v3 = vsel %vm79_vm0, %v70_v0, 0  ;;  %v385_v5 = vld [vmem:[#allocation3 + $0x38] sm:$0xff]  ;;  %vm75_vm1 = vcmask 64512   ;;  %v384_v6 = vld [vmem:[#allocation3 + $0x30] sm:$0xff]  ;;  %s302_s12 = sshll.u32 %s578_s9, 4  ;;  %s303_s12 = int_to_ptr.hbm [resolvable:$true] %s302_s12 }
   0xe   :  { %v69_v4 = vpack.c.bf16 %v68_v2, %v67_v1  ;;  %90 = vmatpush.bf16.msra.mxu0 %v81_v3  ;;  %168 = vmatpush.bf16.msra.mxu1 %v385_v5  ;;  %v383_v7 = vld [vmem:[#allocation3 + $0x28] sm:$0xff]  ;;  %v382_v8 = vld [vmem:[#allocation3 + $0x20] sm:$0xff]  ;;  %v381_v9 = vld [vmem:[#allocation3 + $0x18] sm:$0xff]  ;;  %v286_v50 = vand.u32 127, %v285_v48  ;;  %vm290_vm2 = vcmask 130112   ;;  %vm293_vm3 = vcmask 122880  }
   0xf   :  { %v380_v10 = vld [vmem:[#allocation3 + $0x10] sm:$0xff]  ;;  %v379_v11 = vld [vmem:[#allocation3 + $0x8] sm:$0xff]  ;;  %v378_v12 = vld [vmem:[#allocation3] sm:$0xff] }
  0x10   :  { %v393_v13 = vld [vmem:[#allocation6 + $0x38] sm:$0xff]  ;;  %v392_v14 = vld [vmem:[#allocation6 + $0x30] sm:$0xff]  ;;  %v391_v15 = vld [vmem:[#allocation6 + $0x28] sm:$0xff]  ;;  %v288_v52 = vadd.s32 4294967288, %v286_v50 }
  0x11   :  { %313 = vmatmul.msk.bf16.vlgmr.msra.gmra.mxu0 %vm75_vm1, %v69_v4  ;;  %253 = vmatpush.bf16.msra.mxu2 %v393_v13  ;;  %v390_v16 = vld [vmem:[#allocation6 + $0x20] sm:$0xff]  ;;  %v389_v25 = vld [vmem:[#allocation6 + $0x18] sm:$0xff]  ;;  %v388_v26 = vld [vmem:[#allocation6 + $0x10] sm:$0xff] }
  0x12   :  { %169 = vmatpush.bf16.msra.mxu1 %v384_v6  ;;  %v399_v18 = vld [vmem:[%s571_s2] ss:$0 sm:$0xff]  ;;  %v387_v27 = vld [vmem:[#allocation6 + $0x8] sm:$0xff] }
  0x13   :  { %v386_v28 = vld [vmem:[#allocation6] sm:$0xff] }
  0x14   :  { %v400_v30 = vld [vmem:[%s573_s4] ss:$0 sm:$0xff] }
  0x15   :  { %254 = vmatpush.bf16.msra.mxu2 %v392_v14  ;;  %v401_v37 = vld [vmem:[%s575_s6] ss:$0 sm:$0xff]  ;;  %s485_s6 = smov [#allocation8]  }
  0x16   :  { %170 = vmatpush.bf16.msra.mxu1 %v383_v7  ;;  %v402_v40 = vld [vmem:[%s576_s7] ss:$0 sm:$0xff]  ;;  %s300_s7 = sshll.u32 %s485_s6, 4  ;;  %s301_s7 = int_to_ptr.vmem [resolvable:$true] %s300_s7 }
  0x19   :  { %255 = vmatpush.bf16.msra.mxu2 %v391_v15 }
  0x1a   :  { %171 = vmatpush.bf16.msra.mxu1 %v382_v8 }
  0x1d   :  { %256 = vmatpush.bf16.msra.mxu2 %v390_v16 }
  0x1e   :  { %172 = vmatpush.bf16.msra.mxu1 %v381_v9 }
  0x21   :  { %257 = vmatpush.bf16.msra.mxu2 %v389_v25 }
  0x22   :  { %173 = vmatpush.bf16.msra.mxu1 %v380_v10 }
  0x25   :  { %258 = vmatpush.bf16.msra.mxu2 %v388_v26 }
  0x26   :  { %174 = vmatpush.bf16.msra.mxu1 %v379_v11 }
  0x29   :  { %259 = vmatpush.bf16.msra.mxu2 %v387_v27 }
  0x2a   :  { %175 = vmatpush.bf16.msra.mxu1 %v378_v12 }
  0x2d   :  { %260 = vmatpush.bf16.msra.mxu2 %v386_v28 }
  0x8e   :  { %v92_v17 = vpop.f32.mrf.mxu0 }
  0x8f   :  { %v93_v19 = vadd.f32 %v399_v18, %v92_v17 }
  0x91   :  { %v97_v22 = vmax.f32 %v93_v19, 0.0 }
  0x96   :  { %v94_v20 = vpop.f32.mrf.mxu0 }
  0x97   :  { %v95_v21 = vadd.f32 %v399_v18, %v94_v20 }
  0x99   :  { %v98_v23 = vmax.f32 %v95_v21, 0.0 }
  0x9b   :  { %v99_v24 = vpack.c.bf16 %v98_v23, %v97_v22 }
  0x9d   :  { %176 = vmatmul.bf16.vlgmr.msra.gmra.mxu1 %v99_v24 }
 0x11a   :  { %v177_v29 = vpop.f32.mrf.mxu1 }
 0x11b   :  { %v178_v31 = vadd.f32 %v400_v30, %v177_v29 }
 0x11d   :  { %v182_v34 = vmax.f32 %v178_v31, 0.0 }
 0x122   :  { %v179_v32 = vpop.f32.mrf.mxu1 }
 0x123   :  { %v180_v33 = vadd.f32 %v400_v30, %v179_v32 }
 0x125   :  { %v183_v35 = vmax.f32 %v180_v33, 0.0 }
 0x127   :  { %v184_v36 = vpack.c.bf16 %v183_v35, %v182_v34 }
 0x129   :  { %261 = vmatmul.bf16.vlgmr.msra.gmra.mxu2 %v184_v36 }
 0x1ac   :  { %v262_v38 = vpop.f32.mrf.mxu2 }
 0x1ad   :  { %v263_v39 = vadd.f32 %v401_v37, %v262_v38 }
 0x1af   :  { %v267_v41 = vmax.f32 %v263_v39, 0.0 }
 0x1b1   :  { %v273_v42 = vmul.f32 %v402_v40, %v267_v41 }
 0x1b3   :  { %275 = vadd.xlane.f32.xlu0 %v273_v42 }
 0x1b4   :  { %v264_v43 = vpop.f32.mrf.mxu2 }
 0x1b5   :  { %v265_v44 = vadd.f32 %v401_v37, %v264_v43 }
 0x1b7   :  { %v268_v45 = vmax.f32 %v265_v44, 0.0 }
 0x1b9   :  { %v274_v46 = vmul.f32 %v402_v40, %v268_v45 }
 0x1bb   :  { %277 = vadd.xlane.f32.xlu0 %v274_v46 }
 0x226   :  { %v276_v47 = vpop.xlane.xlu0 %275 }
 0x227   :  { %v281_v51 = vadd.f32 %v280_v49, %v276_v47 }
 0x229   :  { %v287_v55 = vperm.slane %v281_v51, %v286_v50 }
 0x22e   :  { %v278_v53 = vpop.xlane.xlu0 %277 }
 0x22f   :  { %v282_v54 = vadd.f32 %v280_v49, %v278_v53 }
 0x231   :  { %v289_v56 = vperm.slane %v282_v54, %v288_v52 }
 0x233   :  { %v291_v57 = vsel %vm290_vm2, %v289_v56, %v287_v55 }
 0x234   :  { %294 = vst.msk [vmem:[#allocation8] sm:$0x1] %vm293_vm3, %v291_v57 }
 0x235   :  { %305 = dma.vmem_to_hbm [thread:$0]  %s301_s7, 16, %s303_s12, [#allocation5]  }
 0x236   :  { %479 = dma.done.wait [#allocation5], 16  }
 0x237   :  { %480 = vsyncadd [#allocation5], 4294967280 }
 0x238   :  { %310 = vsyncpa [#allocation4], 1 }
 0x239   :  { %311 = vsyncpa [#allocation7], 1 }
 0x23a   :  { %312 = vsyncpa [#allocation5], 1 }

</bundles_post_ra>
